<compile_context>
chip_gen: v6e
topology: v6e:2x2x1
jax: 0.10.0
libtpu: 0.0.40
codegen_flags: <defaults>
</compile_context>

<pallas_src>
import math
from functools import partial

import jax
import jax.numpy as jnp
from jax.experimental import pallas as pl
from jax.experimental.pallas import tpu as pltpu


def _self_attention_kernel(v_ref, k_ref, q_ref, bias_ref,
                           wqkv_ref, wfc_ref, bfc_ref,
                           o_ref, ctx_ref, *,
                           heads, head_dim, block_bs, v_len, k_len, q_len):
    embed = heads * head_dim
    rv = block_bs * v_len
    rk = block_bs * k_len
    rq = block_bs * q_len

    # Flatten (block_bs, L, E) -> (rows, E); lane (E) dim untouched.
    vf = v_ref[...].reshape(rv, embed)
    kf = k_ref[...].reshape(rk, embed)
    qf = q_ref[...].reshape(rq, embed)

    # Single fused projection: rows of [V; K; Q] against the (E, 3E)
    # [Wv | Wk | Wq*1/sqrt(E)] block-diagonal weight.  One MXU weight load,
    # lane-dense N = 3E.  (3x FLOP overhead vs three E x E matmuls, traded for
    # fewer matmul start/drain bubbles and better MXU occupancy at E=128.)
    x = jnp.concatenate([vf, kf, qf], axis=0)                 # (rv+rk+rq, E) bf16
    p = jnp.dot(x, wqkv_ref[...], preferred_element_type=jnp.float32)

    v_p = p[0:rv, 0:embed].reshape(
        block_bs, v_len, embed).astype(jnp.bfloat16)
    k_p = p[rv:rv + rk, embed:2 * embed].reshape(
        block_bs, k_len, embed).astype(jnp.bfloat16)
    q_p = p[rv + rk:rv + rk + rq, 2 * embed:3 * embed].reshape(
        block_bs, q_len, embed).astype(jnp.bfloat16)

    bias = bias_ref[...].astype(jnp.float32)                  # (Bb, q_len, k_len)

    # Heads-only static loop (heads is small); context for each head goes
    # straight into the f32 VMEM scratch slab at its lane offset.
    # TODO(synk): flash-style k_len tiling with online softmax for long seqs.
    for h in range(heads):
        c0 = h * head_dim
        qh = q_p[:, :, c0:c0 + head_dim]                       # (Bb, q, d) bf16
        kh = k_p[:, :, c0:c0 + head_dim]
        vh = v_p[:, :, c0:c0 + head_dim]

        # Scaled energy (scale folded into Wq) + additive mask bias, all f32.
        s = jnp.einsum('bqd,bkd->bqk', qh, kh,
                       preferred_element_type=jnp.float32) + bias
        m = jnp.max(s, axis=-1, keepdims=True)
        e = jnp.exp(s - m)
        denom = jnp.sum(e, axis=-1, keepdims=True)
        attn = (e * pl.reciprocal(denom, approx=True)).astype(jnp.bfloat16)

        ctx_ref[:, :, c0:c0 + head_dim] = jnp.einsum(
            'bqk,bkd->bqd', attn, vh, preferred_element_type=jnp.float32)

    # fc_out: weight pre-transposed to (in, out); bias (1, E) broadcasts.
    ctx = ctx_ref[...].reshape(rq, embed).astype(jnp.bfloat16)
    out = jnp.dot(ctx, wfc_ref[...],
                  preferred_element_type=jnp.float32) + bfc_ref[...]
    o_ref[...] = out.reshape(block_bs, q_len, embed).astype(o_ref.dtype)


def _block_diag(w_t, heads):
    """Block-diagonal (E, E) matrix with `w_t` ((D, D)) on the diagonal."""
    d = w_t.shape[0]
    e = d * heads
    bd = jnp.zeros((e, e), w_t.dtype)
    for h in range(heads):
        bd = bd.at[h * d:(h + 1) * d, h * d:(h + 1) * d].set(w_t)
    return bd


def _pick_block_bs(bs, q_len, target_rows=256):
    """Largest divisor of bs with ~target_rows rows/step, preferring an EVEN
    number of grid steps >= 2 (v7x megacore sharding)."""
    limit = max(1, target_rows // max(q_len, 1))
    best, best_key = 1, None
    for d in range(1, bs + 1):
        if bs % d != 0 or d > limit:
            continue
        steps = bs // d
        if steps < 2 and bs > 1:
            continue
        key = (steps % 2 == 0, d)      # even step count first, then block size
        if best_key is None or key > best_key:
            best, best_key = d, key
    return best


def self_attention(values, keys, query, mask, params, *, embed_size, heads,
                   block_bs=None):
    """values/keys/query: (bs, len, embed_size) f32; mask: (bs,1,q_len,k_len) int."""
    head_dim = embed_size // heads
    bs, v_len, _ = values.shape
    k_len, q_len = keys.shape[1], query.shape[1]

    if block_bs is None:
        block_bs = _pick_block_bs(bs, q_len)
    assert bs % block_bs == 0

    inv_scale = 1.0 / math.sqrt(embed_size)

    # Loop-invariant weight prep (wrapper, once): fused block-diagonal QKV
    # weight with the softmax scale folded into the Q block, fc weight
    # pre-transposed, bias lane-dense.  All MXU weights bf16.
    wv_bd = _block_diag(params['wv'].T, heads)
    wk_bd = _block_diag(params['wk'].T, heads)
    wq_bd = _block_diag(params['wq'].T, heads) * inv_scale
    wqkv = jnp.concatenate([wv_bd, wk_bd, wq_bd], axis=1).astype(jnp.bfloat16)
    wfc_t = params['wfc'].T.astype(jnp.bfloat16)               # (in, out)
    bfc2d = params['bfc'].reshape(1, embed_size).astype(jnp.float32)

    # Additive mask bias: 0 where kept, -1e20/sqrt(E) where masked (equivalent
    # to masked_fill(-1e20) followed by the 1/sqrt(E) scale).  bf16 keeps the
    # masked value hugely negative, so exp underflows to exactly 0.
    if mask is None:
        bias = jnp.zeros((bs, q_len, k_len), jnp.bfloat16)
    else:
        m2 = mask.reshape(bs, q_len, k_len)
        bias = jnp.where(m2 == 0, jnp.float32(-1e20 * inv_scale),
                         jnp.float32(0.0)).astype(jnp.bfloat16)

    # Halve the dominant HBM->VMEM stream: bf16 inputs (MXU is fed bf16 anyway).
    v_bf = values.astype(jnp.bfloat16)
    k_bf = keys.astype(jnp.bfloat16)
    q_bf = query.astype(jnp.bfloat16)

    kernel = partial(_self_attention_kernel, heads=heads, head_dim=head_dim,
                     block_bs=block_bs, v_len=v_len, k_len=k_len, q_len=q_len)

    # VMEM budget: double-buffered ins/outs/weights + scratch + intermediates,
    # with margin; floored at the 32 MiB scoped default, capped at 48 MiB so
    # v7x (64 MiB physical, shared with compiler scratch) keeps headroom.
    in_bytes = block_bs * (v_len + k_len + q_len) * embed_size * 2
    bias_bytes = block_bs * q_len * k_len * 2
    out_bytes = block_bs * q_len * embed_size * 4
    w_bytes = 4 * embed_size * embed_size * 2 + embed_size * 4
    scratch_bytes = block_bs * q_len * embed_size * 4
    inter_bytes = (block_bs * (v_len + k_len + q_len) * 3 * embed_size * 4
                   + 2 * block_bs * q_len * k_len * 4)
    step_bytes = (2 * (in_bytes + bias_bytes + out_bytes + w_bytes)
                  + scratch_bytes + inter_bytes)
    vmem_limit = int(max(32 * 1024 * 1024,
                         min(48 * 1024 * 1024, 4 * step_bytes)))

    grid = (bs // block_bs,)
    return pl.pallas_call(
        kernel,
        out_shape=jax.ShapeDtypeStruct((bs, q_len, embed_size), jnp.float32),
        grid_spec=pltpu.PrefetchScalarGridSpec(
            num_scalar_prefetch=0,
            grid=grid,
            in_specs=[
                pl.BlockSpec((block_bs, v_len, embed_size), lambda i: (i, 0, 0)),
                pl.BlockSpec((block_bs, k_len, embed_size), lambda i: (i, 0, 0)),
                pl.BlockSpec((block_bs, q_len, embed_size), lambda i: (i, 0, 0)),
                pl.BlockSpec((block_bs, q_len, k_len), lambda i: (i, 0, 0)),
                pl.BlockSpec((embed_size, 3 * embed_size), lambda i: (0, 0)),
                pl.BlockSpec((embed_size, embed_size), lambda i: (0, 0)),
                pl.BlockSpec((1, embed_size), lambda i: (0, 0)),
            ],
            out_specs=pl.BlockSpec((block_bs, q_len, embed_size),
                                   lambda i: (i, 0, 0)),
            scratch_shapes=[pltpu.VMEM((block_bs, q_len, embed_size),
                                       jnp.float32)],
        ),
        compiler_params=pltpu.CompilerParams(
            dimension_semantics=("parallel",),
            vmem_limit_bytes=vmem_limit),
    )(v_bf, k_bf, q_bf, bias, wqkv, wfc_t, bfc2d)


def _reference(values, keys, query, mask, params, *, embed_size, heads):
    """Pure-JAX f32 replica of the PyTorch forward, for validation."""
    head_dim = embed_size // heads
    bs, v_len, _ = values.shape
    k_len, q_len = keys.shape[1], query.shape[1]
    v = values.reshape(bs, v_len, heads, head_dim)
    k = keys.reshape(bs, k_len, heads, head_dim)
    q = query.reshape(bs, q_len, heads, head_dim)
    v = jnp.einsum('nlhd,od->nlho', v, params['wv'])
    k = jnp.einsum('nlhd,od->nlho', k, params['wk'])
    q = jnp.einsum('nlhd,od->nlho', q, params['wq'])
    energy = jnp.einsum('nqhd,nkhd->nhqk', q, k)
    if mask is not None:
        energy = jnp.where(mask == 0, -1e20, energy)
    attn = jax.nn.softmax(energy / math.sqrt(embed_size), axis=3)
    out = jnp.einsum('nhql,nlhd->nqhd', attn, v).reshape(bs, q_len, heads * head_dim)
    return jnp.einsum('nqe,oe->nqo', out, params['wfc']) + params['bfc']


if __name__ == "__main__":
    embed_size = 128
    heads = 4
    head_dim = embed_size // heads
    bs = 2
    seq = 8

    key = jax.random.PRNGKey(0)
    ks = jax.random.split(key, 9)

    # Deterministic synthetic parameters (shapes match nn.Linear weights).
    scale_h = 1.0 / math.sqrt(head_dim)
    scale_e = 1.0 / math.sqrt(embed_size)
    params = {
        'wv': jax.random.uniform(ks[0], (head_dim, head_dim), jnp.float32, -scale_h, scale_h),
        'wk': jax.random.uniform(ks[1], (head_dim, head_dim), jnp.float32, -scale_h, scale_h),
        'wq': jax.random.uniform(ks[2], (head_dim, head_dim), jnp.float32, -scale_h, scale_h),
        'wfc': jax.random.uniform(ks[3], (embed_size, embed_size), jnp.float32, -scale_e, scale_e),
        'bfc': jax.random.uniform(ks[4], (embed_size,), jnp.float32, -scale_e, scale_e),
    }

    values = jax.random.normal(ks[5], (bs, seq, embed_size), jnp.float32)
    keys_in = jax.random.normal(ks[6], (bs, seq, embed_size), jnp.float32)
    query = jax.random.normal(ks[7], (bs, seq, embed_size), jnp.float32)

    # Random keep/drop mask; keep the diagonal so no row is fully masked
    # (fully-masked rows are degenerate under either formulation).
    rand_keep = jax.random.uniform(ks[8], (bs, 1, seq, seq)) > 0.3
    diag = jnp.eye(seq, dtype=bool)[None, None]
    mask = (rand_keep | diag).astype(jnp.int32)

    out = self_attention(values, keys_in, query, mask, params,
                         embed_size=embed_size, heads=heads)
    out = jax.block_until_ready(out)

    ref = _reference(values, keys_in, query, mask, params,
                     embed_size=embed_size, heads=heads)
    assert out.shape == (bs, seq, embed_size)
    # bf16 inputs/weights on the MXU + approx reciprocal -> bf16-level tolerance.
    max_err = float(jnp.max(jnp.abs(out - ref)))
    assert jnp.allclose(out, ref, atol=5e-2, rtol=5e-2), max_err

    print("KERNEL_OK")
</pallas_src>

<mosaic_0001>
module attributes {stable_mosaic.version = 11 : i64} {
  func.func @_self_attention_kernel(%arg0: i32, %arg1: memref<1x8x128xbf16, #tpu.memory_space<vmem>>, %arg2: memref<1x8x128xbf16, #tpu.memory_space<vmem>>, %arg3: memref<1x8x128xbf16, #tpu.memory_space<vmem>>, %arg4: memref<1x8x8xbf16, #tpu.memory_space<vmem>>, %arg5: memref<128x384xbf16, #tpu.memory_space<vmem>>, %arg6: memref<128x128xbf16, #tpu.memory_space<vmem>>, %arg7: memref<1x128xf32, #tpu.memory_space<vmem>>, %arg8: memref<1x8x128xf32, #tpu.memory_space<vmem>>, %arg9: memref<1x8x128xf32, #tpu.memory_space<vmem>>) attributes {dimension_semantics = [#tpu.dimension_semantics<parallel>], iteration_bounds = array<i64: 2>, scalar_prefetch = 0 : i64, scratch_operands = 1 : i64, tpu.core_type = #tpu.core_type<tc>, window_params = [{transform_indices = @transform_0, window_bounds = array<i64: 1, 8, 128>}, {transform_indices = @transform_1, window_bounds = array<i64: 1, 8, 128>}, {transform_indices = @transform_2, window_bounds = array<i64: 1, 8, 128>}, {transform_indices = @transform_3, window_bounds = array<i64: 1, 8, 8>}, {pipeline_mode = #tpu.pipeline_mode<synchronous>, transform_indices = @transform_4, window_bounds = array<i64: 128, 384>}, {pipeline_mode = #tpu.pipeline_mode<synchronous>, transform_indices = @transform_5, window_bounds = array<i64: 128, 128>}, {pipeline_mode = #tpu.pipeline_mode<synchronous>, transform_indices = @transform_6, window_bounds = array<i64: 1, 128>}, {transform_indices = @transform_7, window_bounds = array<i64: 1, 8, 128>}]} {
    %c0 = arith.constant 0 : index
    %c0_0 = arith.constant 0 : index
    %c0_1 = arith.constant 0 : index
    %0 = vector.load %arg1[%c0, %c0_0, %c0_1] : memref<1x8x128xbf16, #tpu.memory_space<vmem>>, vector<1x8x128xbf16>
    %1 = vector.shape_cast %0 : vector<1x8x128xbf16> to vector<8x128xbf16>
    %c0_2 = arith.constant 0 : index
    %c0_3 = arith.constant 0 : index
    %c0_4 = arith.constant 0 : index
    %2 = vector.load %arg2[%c0_2, %c0_3, %c0_4] : memref<1x8x128xbf16, #tpu.memory_space<vmem>>, vector<1x8x128xbf16>
    %3 = vector.shape_cast %2 : vector<1x8x128xbf16> to vector<8x128xbf16>
    %c0_5 = arith.constant 0 : index
    %c0_6 = arith.constant 0 : index
    %c0_7 = arith.constant 0 : index
    %4 = vector.load %arg3[%c0_5, %c0_6, %c0_7] : memref<1x8x128xbf16, #tpu.memory_space<vmem>>, vector<1x8x128xbf16>
    %5 = vector.shape_cast %4 : vector<1x8x128xbf16> to vector<8x128xbf16>
    %6 = tpu.concatenate %1, %3, %5 in 0 : vector<8x128xbf16>, vector<8x128xbf16>, vector<8x128xbf16> -> vector<24x128xbf16>
    %c0_8 = arith.constant 0 : index
    %c0_9 = arith.constant 0 : index
    %7 = vector.load %arg5[%c0_8, %c0_9] : memref<128x384xbf16, #tpu.memory_space<vmem>>, vector<128x384xbf16>
    %cst = arith.constant dense<0.000000e+00> : vector<24x384xf32>
    %8 = tpu.matmul %6, %7, %cst {dimension_numbers = #tpu.dot_dimension_numbers<[1], [0], [0], [1], [0, 0, 1, 1], [], []>} : vector<24x128xbf16>, vector<128x384xbf16>, vector<24x384xf32> -> vector<24x384xf32>
    %9 = vector.extract_strided_slice %8 {offsets = [0, 0], sizes = [8, 128], strides = [1, 1]} : vector<24x384xf32> to vector<8x128xf32>
    %10 = vector.shape_cast %9 : vector<8x128xf32> to vector<1x8x128xf32>
    %11 = arith.truncf %10 : vector<1x8x128xf32> to vector<1x8x128xbf16>
    %12 = vector.extract_strided_slice %8 {offsets = [8, 128], sizes = [8, 128], strides = [1, 1]} : vector<24x384xf32> to vector<8x128xf32>
    %13 = vector.shape_cast %12 : vector<8x128xf32> to vector<1x8x128xf32>
    %14 = arith.truncf %13 : vector<1x8x128xf32> to vector<1x8x128xbf16>
    %15 = vector.extract_strided_slice %8 {offsets = [16, 256], sizes = [8, 128], strides = [1, 1]} : vector<24x384xf32> to vector<8x128xf32>
    %16 = vector.shape_cast %15 : vector<8x128xf32> to vector<1x8x128xf32>
    %17 = arith.truncf %16 : vector<1x8x128xf32> to vector<1x8x128xbf16>
    %c0_10 = arith.constant 0 : index
    %c0_11 = arith.constant 0 : index
    %c0_12 = arith.constant 0 : index
    %18 = vector.load %arg4[%c0_10, %c0_11, %c0_12] : memref<1x8x8xbf16, #tpu.memory_space<vmem>>, vector<1x8x8xbf16>
    %19 = arith.extf %18 : vector<1x8x8xbf16> to vector<1x8x8xf32>
    %20 = vector.extract_strided_slice %17 {offsets = [0, 0, 0], sizes = [1, 8, 32], strides = [1, 1, 1]} : vector<1x8x128xbf16> to vector<1x8x32xbf16>
    %21 = vector.extract_strided_slice %14 {offsets = [0, 0, 0], sizes = [1, 8, 32], strides = [1, 1, 1]} : vector<1x8x128xbf16> to vector<1x8x32xbf16>
    %22 = vector.extract_strided_slice %11 {offsets = [0, 0, 0], sizes = [1, 8, 32], strides = [1, 1, 1]} : vector<1x8x128xbf16> to vector<1x8x32xbf16>
    "tpu.trace_start"() <{level = 10 : i32, message = "bqd,bkd->bqk"}> : () -> ()
    %cst_13 = arith.constant dense<0.000000e+00> : vector<1x8x8xf32>
    %23 = tpu.matmul %20, %21, %cst_13 {dimension_numbers = #tpu.dot_dimension_numbers<[2], [2], [1], [1], [0, 0, 0, 1, 1, 1], [0], [0]>} : vector<1x8x32xbf16>, vector<1x8x32xbf16>, vector<1x8x8xf32> -> vector<1x8x8xf32>
    "tpu.trace_stop"() : () -> ()
    %24 = arith.addf %23, %19 : vector<1x8x8xf32>
    %cst_14 = arith.constant dense<0xFF800000> : vector<1x8xf32>
    %25 = vector.multi_reduction <maximumf>, %24, %cst_14 [2] : vector<1x8x8xf32> to vector<1x8xf32>
    %26 = vector.shape_cast %25 : vector<1x8xf32> to vector<1x8x1xf32>
    %27 = vector.broadcast %26 : vector<1x8x1xf32> to vector<1x8x8xf32>
    %28 = arith.subf %24, %27 : vector<1x8x8xf32>
    %29 = math.exp %28 : vector<1x8x8xf32>
    %cst_15 = arith.constant dense<0.000000e+00> : vector<1x8xf32>
    %30 = vector.multi_reduction <add>, %29, %cst_15 [2] : vector<1x8x8xf32> to vector<1x8xf32>
    %31 = vector.shape_cast %30 : vector<1x8xf32> to vector<1x8x1xf32>
    %32 = tpu.reciprocal %31 {approx = true} : vector<1x8x1xf32> -> vector<1x8x1xf32>
    %33 = vector.broadcast %32 : vector<1x8x1xf32> to vector<1x8x8xf32>
    %34 = arith.mulf %29, %33 : vector<1x8x8xf32>
    %35 = arith.truncf %34 : vector<1x8x8xf32> to vector<1x8x8xbf16>
    "tpu.trace_start"() <{level = 10 : i32, message = "bqk,bkd->bqd"}> : () -> ()
    %cst_16 = arith.constant dense<0.000000e+00> : vector<1x8x32xf32>
    %36 = tpu.matmul %35, %22, %cst_16 {dimension_numbers = #tpu.dot_dimension_numbers<[2], [1], [1], [2], [0, 0, 0, 1, 1, 2], [0], [0]>} : vector<1x8x8xbf16>, vector<1x8x32xbf16>, vector<1x8x32xf32> -> vector<1x8x32xf32>
    "tpu.trace_stop"() : () -> ()
    %c0_17 = arith.constant 0 : index
    %c0_18 = arith.constant 0 : index
    %c0_19 = arith.constant 0 : index
    %37 = vector.load %arg9[%c0_17, %c0_18, %c0_19] : memref<1x8x128xf32, #tpu.memory_space<vmem>>, vector<1x8x32xf32>
    tpu.vector_store %arg9[%c0_17, %c0_18, %c0_19], %36 {strides = array<i32>} : memref<1x8x128xf32, #tpu.memory_space<vmem>>, vector<1x8x32xf32>,
    %38 = vector.extract_strided_slice %17 {offsets = [0, 0, 32], sizes = [1, 8, 32], strides = [1, 1, 1]} : vector<1x8x128xbf16> to vector<1x8x32xbf16>
    %39 = vector.extract_strided_slice %14 {offsets = [0, 0, 32], sizes = [1, 8, 32], strides = [1, 1, 1]} : vector<1x8x128xbf16> to vector<1x8x32xbf16>
    %40 = vector.extract_strided_slice %11 {offsets = [0, 0, 32], sizes = [1, 8, 32], strides = [1, 1, 1]} : vector<1x8x128xbf16> to vector<1x8x32xbf16>
    "tpu.trace_start"() <{level = 10 : i32, message = "bqd,bkd->bqk"}> : () -> ()
    %cst_20 = arith.constant dense<0.000000e+00> : vector<1x8x8xf32>
    %41 = tpu.matmul %38, %39, %cst_20 {dimension_numbers = #tpu.dot_dimension_numbers<[2], [2], [1], [1], [0, 0, 0, 1, 1, 1], [0], [0]>} : vector<1x8x32xbf16>, vector<1x8x32xbf16>, vector<1x8x8xf32> -> vector<1x8x8xf32>
    "tpu.trace_stop"() : () -> ()
    %42 = arith.addf %41, %19 : vector<1x8x8xf32>
    %cst_21 = arith.constant dense<0xFF800000> : vector<1x8xf32>
    %43 = vector.multi_reduction <maximumf>, %42, %cst_21 [2] : vector<1x8x8xf32> to vector<1x8xf32>
    %44 = vector.shape_cast %43 : vector<1x8xf32> to vector<1x8x1xf32>
    %45 = vector.broadcast %44 : vector<1x8x1xf32> to vector<1x8x8xf32>
    %46 = arith.subf %42, %45 : vector<1x8x8xf32>
    %47 = math.exp %46 : vector<1x8x8xf32>
    %cst_22 = arith.constant dense<0.000000e+00> : vector<1x8xf32>
    %48 = vector.multi_reduction <add>, %47, %cst_22 [2] : vector<1x8x8xf32> to vector<1x8xf32>
    %49 = vector.shape_cast %48 : vector<1x8xf32> to vector<1x8x1xf32>
    %50 = tpu.reciprocal %49 {approx = true} : vector<1x8x1xf32> -> vector<1x8x1xf32>
    %51 = vector.broadcast %50 : vector<1x8x1xf32> to vector<1x8x8xf32>
    %52 = arith.mulf %47, %51 : vector<1x8x8xf32>
    %53 = arith.truncf %52 : vector<1x8x8xf32> to vector<1x8x8xbf16>
    "tpu.trace_start"() <{level = 10 : i32, message = "bqk,bkd->bqd"}> : () -> ()
    %cst_23 = arith.constant dense<0.000000e+00> : vector<1x8x32xf32>
    %54 = tpu.matmul %53, %40, %cst_23 {dimension_numbers = #tpu.dot_dimension_numbers<[2], [1], [1], [2], [0, 0, 0, 1, 1, 2], [0], [0]>} : vector<1x8x8xbf16>, vector<1x8x32xbf16>, vector<1x8x32xf32> -> vector<1x8x32xf32>
    "tpu.trace_stop"() : () -> ()
    %c0_24 = arith.constant 0 : index
    %c0_25 = arith.constant 0 : index
    %c32 = arith.constant 32 : index
    %55 = vector.load %arg9[%c0_24, %c0_25, %c32] : memref<1x8x128xf32, #tpu.memory_space<vmem>>, vector<1x8x32xf32>
    tpu.vector_store %arg9[%c0_24, %c0_25, %c32], %54 {strides = array<i32>} : memref<1x8x128xf32, #tpu.memory_space<vmem>>, vector<1x8x32xf32>,
    %56 = vector.extract_strided_slice %17 {offsets = [0, 0, 64], sizes = [1, 8, 32], strides = [1, 1, 1]} : vector<1x8x128xbf16> to vector<1x8x32xbf16>
    %57 = vector.extract_strided_slice %14 {offsets = [0, 0, 64], sizes = [1, 8, 32], strides = [1, 1, 1]} : vector<1x8x128xbf16> to vector<1x8x32xbf16>
    %58 = vector.extract_strided_slice %11 {offsets = [0, 0, 64], sizes = [1, 8, 32], strides = [1, 1, 1]} : vector<1x8x128xbf16> to vector<1x8x32xbf16>
    "tpu.trace_start"() <{level = 10 : i32, message = "bqd,bkd->bqk"}> : () -> ()
    %cst_26 = arith.constant dense<0.000000e+00> : vector<1x8x8xf32>
    %59 = tpu.matmul %56, %57, %cst_26 {dimension_numbers = #tpu.dot_dimension_numbers<[2], [2], [1], [1], [0, 0, 0, 1, 1, 1], [0], [0]>} : vector<1x8x32xbf16>, vector<1x8x32xbf16>, vector<1x8x8xf32> -> vector<1x8x8xf32>
    "tpu.trace_stop"() : () -> ()
    %60 = arith.addf %59, %19 : vector<1x8x8xf32>
    %cst_27 = arith.constant dense<0xFF800000> : vector<1x8xf32>
    %61 = vector.multi_reduction <maximumf>, %60, %cst_27 [2] : vector<1x8x8xf32> to vector<1x8xf32>
    %62 = vector.shape_cast %61 : vector<1x8xf32> to vector<1x8x1xf32>
    %63 = vector.broadcast %62 : vector<1x8x1xf32> to vector<1x8x8xf32>
    %64 = arith.subf %60, %63 : vector<1x8x8xf32>
    %65 = math.exp %64 : vector<1x8x8xf32>
    %cst_28 = arith.constant dense<0.000000e+00> : vector<1x8xf32>
    %66 = vector.multi_reduction <add>, %65, %cst_28 [2] : vector<1x8x8xf32> to vector<1x8xf32>
    %67 = vector.shape_cast %66 : vector<1x8xf32> to vector<1x8x1xf32>
    %68 = tpu.reciprocal %67 {approx = true} : vector<1x8x1xf32> -> vector<1x8x1xf32>
    %69 = vector.broadcast %68 : vector<1x8x1xf32> to vector<1x8x8xf32>
    %70 = arith.mulf %65, %69 : vector<1x8x8xf32>
    %71 = arith.truncf %70 : vector<1x8x8xf32> to vector<1x8x8xbf16>
    "tpu.trace_start"() <{level = 10 : i32, message = "bqk,bkd->bqd"}> : () -> ()
    %cst_29 = arith.constant dense<0.000000e+00> : vector<1x8x32xf32>
    %72 = tpu.matmul %71, %58, %cst_29 {dimension_numbers = #tpu.dot_dimension_numbers<[2], [1], [1], [2], [0, 0, 0, 1, 1, 2], [0], [0]>} : vector<1x8x8xbf16>, vector<1x8x32xbf16>, vector<1x8x32xf32> -> vector<1x8x32xf32>
    "tpu.trace_stop"() : () -> ()
    %c0_30 = arith.constant 0 : index
    %c0_31 = arith.constant 0 : index
    %c64 = arith.constant 64 : index
    %73 = vector.load %arg9[%c0_30, %c0_31, %c64] : memref<1x8x128xf32, #tpu.memory_space<vmem>>, vector<1x8x32xf32>
    tpu.vector_store %arg9[%c0_30, %c0_31, %c64], %72 {strides = array<i32>} : memref<1x8x128xf32, #tpu.memory_space<vmem>>, vector<1x8x32xf32>,
    %74 = vector.extract_strided_slice %17 {offsets = [0, 0, 96], sizes = [1, 8, 32], strides = [1, 1, 1]} : vector<1x8x128xbf16> to vector<1x8x32xbf16>
    %75 = vector.extract_strided_slice %14 {offsets = [0, 0, 96], sizes = [1, 8, 32], strides = [1, 1, 1]} : vector<1x8x128xbf16> to vector<1x8x32xbf16>
    %76 = vector.extract_strided_slice %11 {offsets = [0, 0, 96], sizes = [1, 8, 32], strides = [1, 1, 1]} : vector<1x8x128xbf16> to vector<1x8x32xbf16>
    "tpu.trace_start"() <{level = 10 : i32, message = "bqd,bkd->bqk"}> : () -> ()
    %cst_32 = arith.constant dense<0.000000e+00> : vector<1x8x8xf32>
    %77 = tpu.matmul %74, %75, %cst_32 {dimension_numbers = #tpu.dot_dimension_numbers<[2], [2], [1], [1], [0, 0, 0, 1, 1, 1], [0], [0]>} : vector<1x8x32xbf16>, vector<1x8x32xbf16>, vector<1x8x8xf32> -> vector<1x8x8xf32>
    "tpu.trace_stop"() : () -> ()
    %78 = arith.addf %77, %19 : vector<1x8x8xf32>
    %cst_33 = arith.constant dense<0xFF800000> : vector<1x8xf32>
    %79 = vector.multi_reduction <maximumf>, %78, %cst_33 [2] : vector<1x8x8xf32> to vector<1x8xf32>
    %80 = vector.shape_cast %79 : vector<1x8xf32> to vector<1x8x1xf32>
    %81 = vector.broadcast %80 : vector<1x8x1xf32> to vector<1x8x8xf32>
    %82 = arith.subf %78, %81 : vector<1x8x8xf32>
    %83 = math.exp %82 : vector<1x8x8xf32>
    %cst_34 = arith.constant dense<0.000000e+00> : vector<1x8xf32>
    %84 = vector.multi_reduction <add>, %83, %cst_34 [2] : vector<1x8x8xf32> to vector<1x8xf32>
    %85 = vector.shape_cast %84 : vector<1x8xf32> to vector<1x8x1xf32>
    %86 = tpu.reciprocal %85 {approx = true} : vector<1x8x1xf32> -> vector<1x8x1xf32>
    %87 = vector.broadcast %86 : vector<1x8x1xf32> to vector<1x8x8xf32>
    %88 = arith.mulf %83, %87 : vector<1x8x8xf32>
    %89 = arith.truncf %88 : vector<1x8x8xf32> to vector<1x8x8xbf16>
    "tpu.trace_start"() <{level = 10 : i32, message = "bqk,bkd->bqd"}> : () -> ()
    %cst_35 = arith.constant dense<0.000000e+00> : vector<1x8x32xf32>
    %90 = tpu.matmul %89, %76, %cst_35 {dimension_numbers = #tpu.dot_dimension_numbers<[2], [1], [1], [2], [0, 0, 0, 1, 1, 2], [0], [0]>} : vector<1x8x8xbf16>, vector<1x8x32xbf16>, vector<1x8x32xf32> -> vector<1x8x32xf32>
    "tpu.trace_stop"() : () -> ()
    %c0_36 = arith.constant 0 : index
    %c0_37 = arith.constant 0 : index
    %c96 = arith.constant 96 : index
    %91 = vector.load %arg9[%c0_36, %c0_37, %c96] : memref<1x8x128xf32, #tpu.memory_space<vmem>>, vector<1x8x32xf32>
    tpu.vector_store %arg9[%c0_36, %c0_37, %c96], %90 {strides = array<i32>} : memref<1x8x128xf32, #tpu.memory_space<vmem>>, vector<1x8x32xf32>,
    %c0_38 = arith.constant 0 : index
    %c0_39 = arith.constant 0 : index
    %c0_40 = arith.constant 0 : index
    %92 = vector.load %arg9[%c0_38, %c0_39, %c0_40] : memref<1x8x128xf32, #tpu.memory_space<vmem>>, vector<1x8x128xf32>
    %93 = vector.shape_cast %92 : vector<1x8x128xf32> to vector<8x128xf32>
    %94 = arith.truncf %93 : vector<8x128xf32> to vector<8x128xbf16>
    %c0_41 = arith.constant 0 : index
    %c0_42 = arith.constant 0 : index
    %95 = vector.load %arg6[%c0_41, %c0_42] : memref<128x128xbf16, #tpu.memory_space<vmem>>, vector<128x128xbf16>
    %cst_43 = arith.constant dense<0.000000e+00> : vector<8x128xf32>
    %96 = tpu.matmul %94, %95, %cst_43 {dimension_numbers = #tpu.dot_dimension_numbers<[1], [0], [0], [1], [0, 0, 1, 1], [], []>} : vector<8x128xbf16>, vector<128x128xbf16>, vector<8x128xf32> -> vector<8x128xf32>
    %c0_44 = arith.constant 0 : index
    %c0_45 = arith.constant 0 : index
    %97 = vector.load %arg7[%c0_44, %c0_45] : memref<1x128xf32, #tpu.memory_space<vmem>>, vector<1x128xf32>
    %98 = vector.broadcast %97 : vector<1x128xf32> to vector<8x128xf32>
    %99 = arith.addf %96, %98 : vector<8x128xf32>
    %100 = vector.shape_cast %99 : vector<8x128xf32> to vector<1x8x128xf32>
    %c0_46 = arith.constant 0 : index
    %c0_47 = arith.constant 0 : index
    %c0_48 = arith.constant 0 : index
    %101 = vector.load %arg8[%c0_46, %c0_47, %c0_48] : memref<1x8x128xf32, #tpu.memory_space<vmem>>, vector<1x8x128xf32>
    tpu.vector_store %arg8[%c0_46, %c0_47, %c0_48], %100 {strides = array<i32>} : memref<1x8x128xf32, #tpu.memory_space<vmem>>, vector<1x8x128xf32>,
    return
  }
  func.func @transform_0(%arg0: i32) -> (i32, i32, i32) {
    %c0_i32 = arith.constant 0 : i32
    %c0_i32_0 = arith.constant 0 : i32
    %c0_i32_1 = arith.constant 0 : i32
    return %arg0, %c0_i32, %c0_i32_0 : i32, i32, i32
  }
  func.func @transform_1(%arg0: i32) -> (i32, i32, i32) {
    %c0_i32 = arith.constant 0 : i32
    %c0_i32_0 = arith.constant 0 : i32
    %c0_i32_1 = arith.constant 0 : i32
    return %arg0, %c0_i32, %c0_i32_0 : i32, i32, i32
  }
  func.func @transform_2(%arg0: i32) -> (i32, i32, i32) {
    %c0_i32 = arith.constant 0 : i32
    %c0_i32_0 = arith.constant 0 : i32
    %c0_i32_1 = arith.constant 0 : i32
    return %arg0, %c0_i32, %c0_i32_0 : i32, i32, i32
  }
  func.func @transform_3(%arg0: i32) -> (i32, i32, i32) {
    %c0_i32 = arith.constant 0 : i32
    %c0_i32_0 = arith.constant 0 : i32
    %c0_i32_1 = arith.constant 0 : i32
    return %arg0, %c0_i32, %c0_i32_0 : i32, i32, i32
  }
  func.func @transform_4(%arg0: i32) -> (i32, i32) {
    %c0_i32 = arith.constant 0 : i32
    %c0_i32_0 = arith.constant 0 : i32
    %c0_i32_1 = arith.constant 0 : i32
    return %c0_i32, %c0_i32_0 : i32, i32
  }
  func.func @transform_5(%arg0: i32) -> (i32, i32) {
    %c0_i32 = arith.constant 0 : i32
    %c0_i32_0 = arith.constant 0 : i32
    %c0_i32_1 = arith.constant 0 : i32
    return %c0_i32, %c0_i32_0 : i32, i32
  }
  func.func @transform_6(%arg0: i32) -> (i32, i32) {
    %c0_i32 = arith.constant 0 : i32
    %c0_i32_0 = arith.constant 0 : i32
    %c0_i32_1 = arith.constant 0 : i32
    return %c0_i32, %c0_i32_0 : i32, i32
  }
  func.func @transform_7(%arg0: i32) -> (i32, i32, i32) {
    %c0_i32 = arith.constant 0 : i32
    %c0_i32_0 = arith.constant 0 : i32
    %c0_i32_1 = arith.constant 0 : i32
    return %arg0, %c0_i32, %c0_i32_0 : i32, i32, i32
  }
}

</mosaic_0001>

<bundles_post_ra>
// kernel: tpu_custom_call.1
= control target key start
LH: loop header
LB: loop body
LE: loop exit
PB: predicated region body
PF: predicated region fallthrough
CT: control target
= control target key end

     0   :  { %s2468_s0 = inlined_call_operand.hbm [shape: bf16[2,8,128], index: 0, kind: input, shape index: {}]   ;;  %s2469_s1 = inlined_call_operand.hbm [shape: bf16[2,8,128], index: 1, kind: input, shape index: {}]   ;;  %s2470_s2 = inlined_call_operand.hbm [shape: bf16[2,8,128], index: 2, kind: input, shape index: {}]   ;;  %s2471_s3 = inlined_call_operand.hbm [shape: bf16[2,8,8], index: 3, kind: input, shape index: {}]   ;;  %s2472_s4 = inlined_call_operand.hbm [shape: bf16[128,384], index: 4, kind: input, shape index: {}]   ;;  %s2473_s5 = inlined_call_operand.hbm [shape: bf16[128,128], index: 5, kind: input, shape index: {}]   ;;  %s2474_s6 = inlined_call_operand.vmem [shape: f32[1,128], index: 6, kind: input, shape index: {}]   ;;  %s2475_s7 = inlined_call_operand.hbm [shape: f32[2,8,128], index: 7, kind: output, shape index: {}]  }
   0x1   :  { %2490 = sst [smem:[#allocation25_spill]] %s2469_s1 }
   0x2   :  { %2491 = sst [smem:[#allocation26_spill]] %s2472_s4 }
   0x3   :  { %2492 = sst [smem:[#allocation27_spill]] %s2474_s6 }
   0x4   :  { %2493 = sst [smem:[#allocation28_spill]] %s2475_s7 }
   0x5   :  { %12 = vsyncpa [#allocation4], 0 }
   0x6   :  { %14 = vsyncpa [#allocation4 + $0x1], 0 }
   0x7   :  { %15 = vsyncpa [#allocation7], 0 }
   0x8   :  { %17 = vsyncpa [#allocation7 + $0x1], 0 }
   0x9   :  { %18 = vsyncpa [#allocation10], 0 }
   0xa   :  { %20 = vsyncpa [#allocation10 + $0x1], 0 }
   0xb   :  { %21 = vsyncpa [#allocation13], 0 }
   0xc   :  { %22 = vsyncpa [#allocation5], 0 }
   0xd   :  { %24 = vsyncpa [#allocation5 + $0x1], 0  ;;  %s2084_s24 = smov 0   ;;  %s2086_s25 = smov 0  }
   0xe   :  { %s2088_s26 = smov 0   ;;  %s2090_s27 = smov 0  }
   0xf LB: > { %2494 = sst [smem:[#allocation21_spill]] %s2013_s24  ;;  %s2105_s28 = sadd.s32 4294967295, %s2025_s27   ;;  %s2025_s27 = sphi %s2090_s27, %s2524_s27   ;;  %s2021_s26 = sphi %s2088_s26, %s2528_s26   ;;  %s2017_s25 = sphi %s2086_s25, %s2527_s25   ;;  %s2013_s24 = sphi %s2084_s24, %s2526_s24  }
  0x10   : > { %s1442_s29 = sadd.s32 4294967294, %s2025_s27   ;;  %p50_p0 = scmp.ne.s32.totalorder %s2017_s25, %s2013_s24 }
  0x11   : > { %p2479_p1 = scmp.eq.s32.totalorder %s2105_s28, 0  ;;  %p215_p2 = scmp.eq.s32.totalorder %s2105_s28, 1 }
  0x12   : > { %p221_p3 = scmp.eq.s32.totalorder %s1442_s29, 1  ;;  %p1443_p5 = scmp.ge.s32.totalorder %s2025_s27, 1 }
  0x13   : > { %p2114_p4 = por %p2479_p1, %p50_p0  ;;  %p228_p7 = scmp.lt.s32.totalorder %s2025_s27, 3 }
  0x14   : > { %p2119_p6 = por %p221_p3, %p50_p0  ;;  %s2027_s10 = smov [#allocation11]  }
  0x15   : > { %s2495_s30 = scalar_select %p2114_p4, 1, 0 }
  0x16   : > { %s2496_s8 = scalar_select %p2119_p6, 1, 0 }
  0x17   : > { %p2124_p8 = pnand %p1443_p5, %p228_p7  ;;  %s240_s11 = sshll.u32 %s2027_s10, 4  ;;  %s241_s11 = int_to_ptr.vmem [resolvable:$true] %s240_s11 }
  0x18   : > { %2497 = sst [smem:[#allocation22_spill]] %s2496_s8  ;;  %s2138_s13 = sadd.s32 1, %s2025_s27  }
  0x19   : > { %s2498_s9 = scalar_select %p2124_p8, 1, 0 }
  0x1a   : > { %p1650_p9 = pneg %p2124_p8  ;;  %2500 = sst [smem:[#allocation23_spill]] %s2138_s13 }
  0x1b   : > { %s37_s14 = sadd.s32 1, %s2021_s26  ;;  %s34_s15 = ssub.s32 %s2025_s27, %s2138_s13 }
  0x1c   : > { %p2133_p11 = pnand %p1650_p9, %p2479_p1  ;;  %s1792_s16 = scalar_lea.vmem %s241_s11, 3072 }
  0x1d   : > { %p1793_p13 = scmp.ne.s32.totalorder %s241_s11, %s1792_s16  ;;  %p1800_p5 = scmp.lt.s32.totalorder %s241_s11, %s241_s11 }
  0x1e   : > { %s2499_s12 = scalar_select %p2133_p11, 1, 0 }
  0x1f   : > { %p2480_p12 = pneg %p2133_p11  ;;  %p1801_p7 = scmp.lt.s32.totalorder %s1792_s16, %s1792_s16 }
  0x21   : > { %p1795_p0 = pnand %p1793_p13, %p2480_p12  ;;  %p1802_p9 = por %p1801_p7, %p1800_p5 }
  0x23   : > { %p1796_p3 = pneg %p1795_p0 }
  0x25   : > { %p1803_p10 = pnand %p1802_p9, %p1796_p3 }
  0x27   : > { %1806 = shalt.err (!%p1803_p10)
}
  0x28   : > { %s2028_s17 = smov 192   ;;  %s2029_s18 = smov 12  }
  0x29   : > { %s2501_s4 = sld [smem:[#allocation26_spill]]  ;;  %p35_p13 = scmp.eq.s32.totalorder %s34_s15, 0 }
  0x2a   : > { %p44_p10 = scmp.ne.s32.totalorder %s2021_s26, %s2017_s25  ;;  %p45_p0 = scmp.eq.s32.totalorder %s2025_s27, 0 }
  0x2b   : > { %p1676_p3 = scmp.lt.s32.totalorder %s2025_s27, 2  ;;  %s2476_s23 = sand.u32 1, %s2021_s26  }
  0x2c   : > { %s2158_s21 = scalar_select %p35_p13, %s2021_s26, %s37_s14  }
  0x2d   : > { %p46_p5 = por %p45_p0, %p44_p10  ;;  %p2162_p7 = por %p215_p2, %p44_p10 }
  0x2e   : > { %2502 = sst [smem:[#allocation24_spill]] %s2158_s21  ;;  %s2168_s29 = sshll.u32 %s2025_s27, 6 }
  0x2f   : > { %1653 = dma.hbm_to_vmem [thread:$0]  (!%p2133_p11), %s2501_s4, 3072, %s241_s11, [#allocation10], %s2028_s17, %s2028_s17, %s2029_s18  }
  0x30   : > { %s2503_s22 = scalar_select %p2162_p7, 1, 0 }
  0x31   : > { %s2172_s10 = sshll.u32 %s2476_s23, 2  ;;  %p2174_p9 = pnand %p1676_p3, %p46_p5 }
  0x32   : > { %s2481_s14 = sand.u32 1, %s2025_s27   ;;  %s2505_s1 = sld [smem:[#allocation25_spill]] }
  0x33   : > { %s292_s18 = scalar_lea.vmem [#allocation6], %s2172_s10  ;;  %s2188_s20 = scalar_lea.sflag [#allocation7], %s2481_s14 }
  0x34   : > { %s299_s19 = sshll.u32 %s292_s18, 4  ;;  %p2194_p13 = pneg %p2174_p9  ;;  %s300_s19 = int_to_ptr.vmem [resolvable:$true] %s299_s19 }
  0x38   : > { %s2183_s17 = scalar_lea.hbm %s2505_s1, %s2168_s29  ;;  %s1812_s21 = scalar_lea.hbm %s2505_s1, 128 }
  0x39   : > { %s1807_s23 = scalar_lea.hbm %s2183_s17, 64  ;;  %p1813_p3 = scmp.lt.s32.totalorder %s2183_s17, %s2505_s1 }
  0x3a   : > { %p1808_p2 = scmp.ne.s32.totalorder %s2183_s17, %s1807_s23  ;;  %p1814_p5 = scmp.lt.s32.totalorder %s1812_s21, %s1807_s23 }
  0x3c   : > { %p1810_p10 = pnand %p2194_p13, %p1808_p2  ;;  %p1815_p1 = por %p1814_p5, %p1813_p3 }
  0x3e   : > { %p1811_p0 = pneg %p1810_p10 }
  0x40   : > { %p1816_p12 = pnand %p1815_p1, %p1811_p0 }
  0x42   : > { %1819 = shalt.err (!%p1816_p12)
}
  0x43   : > { %s1820_s14 = scalar_lea.vmem %s300_s19, 64  ;;  %s2030_s8 = smov [#allocation6]  }
  0x44   : > { %p1821_p6 = scmp.ne.s32.totalorder %s300_s19, %s1820_s14  ;;  %s1825_s24 = sshll.u32 %s2030_s8, 4  ;;  %s1826_s24 = int_to_ptr.vmem [resolvable:$false] %s1825_s24 }
  0x45   : > { %s1827_s7 = scalar_lea.vmem %s1826_s24, 128  ;;  %p1828_p2 = scmp.lt.s32.totalorder %s300_s19, %s1826_s24 }
  0x46   : > { %p1823_p7 = pnand %p1821_p6, %p2194_p13  ;;  %p1829_p10 = scmp.lt.s32.totalorder %s1827_s7, %s1820_s14 }
  0x48   : > { %p1824_p4 = pneg %p1823_p7  ;;  %p1830_p8 = por %p1829_p10, %p1828_p2 }
  0x4a   : > { %p1831_p11 = pnand %p1830_p8, %p1824_p4 }
  0x4c   : > { %1834 = shalt.err (!%p1831_p11)
}
  0x4d   : > { %1663 = dma.hbm_to_vmem [thread:$0]  (!%p2174_p9), %s2183_s17, 64, %s300_s19, %s2188_s20  }
  0x4e   : > { %s2031_s13 = smov [#allocation12]   ;;  %p2507_p6 = scmp.ne.s32.totalorder %s2499_s12, 0 }
  0x4f   : > { %s253_s21 = sshll.u32 %s2031_s13, 4  ;;  %s254_s21 = int_to_ptr.vmem [resolvable:$true] %s253_s21 }
  0x50   : > { %s1846_s23 = scalar_lea.vmem %s254_s21, 1024  ;;  %p2508_p12 = pneg %p2507_p6 }
  0x51   : > { %p1847_p1 = scmp.ne.s32.totalorder %s254_s21, %s1846_s23  ;;  %p1854_p3 = scmp.lt.s32.totalorder %s254_s21, %s254_s21 }
  0x52   : > { %p1855_p5 = scmp.lt.s32.totalorder %s1846_s23, %s1846_s23 }
  0x53   : > { %p1849_p7 = pnand %p1847_p1, %p2508_p12 }
  0x54   : > { %p1856_p2 = por %p1855_p5, %p1854_p3 }
  0x55   : > { %p1850_p0 = pneg %p1849_p7 }
  0x57   : > { %p1857_p4 = pnand %p1856_p2, %p1850_p0 }
  0x59   : > { %1860 = shalt.err (!%p1857_p4)
}
  0x5a   : > { %s2032_s7 = smov 64   ;;  %s2033_s24 = smov 4  }
  0x5b   : > { %1656 = dma.hbm_to_vmem [thread:$0]  (!%p2507_p6), %s2473_s5, 1024, %s254_s21, [#allocation13], %s2032_s7, %s2032_s7, %s2033_s24  }
  0x5c   : > { %s2225_s15 = scalar_lea.hbm %s2468_s0, %s2168_s29  ;;  %s274_s16 = scalar_lea.vmem [#allocation3], %s2172_s10 }
  0x5d   : > { %s281_s18 = sshll.u32 %s274_s16, 4  ;;  %s2232_s1 = scalar_lea.hbm %s2470_s2, %s2168_s29  ;;  %s282_s18 = int_to_ptr.vmem [resolvable:$true] %s281_s18 }
  0x5e   : > { %s2509_s12 = sand.u32 1, %s2021_s26   ;;  %s1861_s8 = scalar_lea.hbm %s2225_s15, 64 }
  0x5f   : > { %s271_s6 = scalar_lea.sflag [#allocation4], %s2509_s12  ;;  %p1862_p8 = scmp.ne.s32.totalorder %s2225_s15, %s1861_s8 }
  0x60   : > { %s1866_s24 = scalar_lea.hbm %s2468_s0, 128  ;;  %p1867_p1 = scmp.lt.s32.totalorder %s2225_s15, %s2468_s0 }
  0x61   : > { %p1864_p11 = pnand %p1862_p8, %p2194_p13  ;;  %p1868_p6 = scmp.lt.s32.totalorder %s1866_s24, %s1861_s8 }
  0x63   : > { %p1865_p10 = pneg %p1864_p11  ;;  %p1869_p12 = por %p1868_p6, %p1867_p1 }
  0x65   : > { %p1870_p7 = pnand %p1869_p12, %p1865_p10 }
  0x67   : > { %1873 = shalt.err (!%p1870_p7)
}
  0x68   : > { %s1874_s19 = scalar_lea.vmem %s282_s18, 64  ;;  %s2034_s16 = smov [#allocation3]  }
  0x69   : > { %p1875_p0 = scmp.ne.s32.totalorder %s282_s18, %s1874_s19  ;;  %s1879_s13 = sshll.u32 %s2034_s16, 4  ;;  %s1880_s13 = int_to_ptr.vmem [resolvable:$false] %s1879_s13 }
  0x6a   : > { %s1881_s23 = scalar_lea.vmem %s1880_s13, 128  ;;  %p1882_p2 = scmp.lt.s32.totalorder %s282_s18, %s1880_s13 }
  0x6b   : > { %p1877_p3 = pnand %p1875_p0, %p2194_p13  ;;  %p1883_p4 = scmp.lt.s32.totalorder %s1881_s23, %s1874_s19 }
  0x6d   : > { %p1878_p5 = pneg %p1877_p3  ;;  %p1884_p8 = por %p1883_p4, %p1882_p2 }
  0x6f   : > { %p1885_p11 = pnand %p1884_p8, %p1878_p5 }
  0x71   : > { %1888 = shalt.err (!%p1885_p11)
}
  0x72   : > { %1660 = dma.hbm_to_vmem [thread:$0]  (!%p2174_p9), %s2225_s15, 64, %s282_s18, %s271_s6  }
  0x73   : > { %s310_s12 = scalar_lea.vmem [#allocation8], %s2172_s10  ;;  %s2257_s24 = scalar_lea.hbm %s2471_s3, %s2168_s29 }
  0x74   : > { %s317_s8 = sshll.u32 %s310_s12, 4  ;;  %s1889_s14 = scalar_lea.hbm %s2232_s1, 64  ;;  %s318_s8 = int_to_ptr.vmem [resolvable:$true] %s317_s8 }
  0x75   : > { %p1890_p10 = scmp.ne.s32.totalorder %s2232_s1, %s1889_s14  ;;  %s1894_s16 = scalar_lea.hbm %s2470_s2, 128 }
  0x76   : > { %p1895_p12 = scmp.lt.s32.totalorder %s2232_s1, %s2470_s2  ;;  %p1896_p7 = scmp.lt.s32.totalorder %s1894_s16, %s1889_s14 }
  0x77   : > { %p1892_p1 = pnand %p1890_p10, %p2194_p13 }
  0x78   : > { %p1897_p0 = por %p1896_p7, %p1895_p12 }
  0x79   : > { %p1893_p6 = pneg %p1892_p1 }
  0x7b   : > { %p1898_p3 = pnand %p1897_p0, %p1893_p6 }
  0x7d   : > { %1901 = shalt.err (!%p1898_p3)
}
  0x7e   : > { %s1902_s6 = scalar_lea.vmem %s318_s8, 64  ;;  %s2035_s29 = smov [#allocation8]  }
  0x7f   : > { %p1903_p5 = scmp.ne.s32.totalorder %s318_s8, %s1902_s6  ;;  %s1907_s15 = sshll.u32 %s2035_s29, 4  ;;  %s1908_s15 = int_to_ptr.vmem [resolvable:$false] %s1907_s15 }
  0x80   : > { %s1909_s18 = scalar_lea.vmem %s1908_s15, 128  ;;  %p1910_p8 = scmp.lt.s32.totalorder %s318_s8, %s1908_s15 }
  0x81   : > { %p1905_p2 = pnand %p1903_p5, %p2194_p13  ;;  %p1911_p11 = scmp.lt.s32.totalorder %s1909_s18, %s1902_s6 }
  0x83   : > { %p1906_p4 = pneg %p1905_p2  ;;  %p1912_p10 = por %p1911_p11, %p1910_p8 }
  0x85   : > { %p1913_p1 = pnand %p1912_p10, %p1906_p4 }
  0x87   : > { %1916 = shalt.err (!%p1913_p1)
}
  0x88   : > { %1666 = dma.hbm_to_vmem [thread:$0]  (!%p2174_p9), %s2232_s1, 64, %s318_s8, %s2188_s20  }
  0x89   : > { %s328_s12 = scalar_lea.vmem [#allocation9], %s2172_s10  ;;  %s2510_s7 = sand.u32 1, %s2025_s27  }
  0x8a   : > { %s335_s21 = sshll.u32 %s328_s12, 4  ;;  %s325_s14 = scalar_lea.sflag [#allocation10], %s2510_s7  ;;  %s336_s21 = int_to_ptr.vmem [resolvable:$true] %s335_s21 }
  0x8b   : > { %s1917_s17 = scalar_lea.hbm %s2257_s24, 64  ;;  %s1922_s13 = scalar_lea.hbm %s2471_s3, 128 }
  0x8c   : > { %p1918_p6 = scmp.ne.s32.totalorder %s2257_s24, %s1917_s17  ;;  %p1923_p0 = scmp.lt.s32.totalorder %s2257_s24, %s2471_s3 }
  0x8d   : > { %p1924_p3 = scmp.lt.s32.totalorder %s1922_s13, %s1917_s17 }
  0x8e   : > { %p1920_p12 = pnand %p1918_p6, %p2194_p13 }
  0x8f   : > { %p1925_p5 = por %p1924_p3, %p1923_p0 }
  0x90   : > { %p1921_p7 = pneg %p1920_p12 }
  0x92   : > { %p1926_p2 = pnand %p1925_p5, %p1921_p7 }
  0x94   : > { %1929 = shalt.err (!%p1926_p2)
}
  0x95   : > { %s1930_s1 = scalar_lea.vmem %s336_s21, 64  ;;  %s2036_s10 = smov [#allocation9]  }
  0x96   : > { %p1931_p4 = scmp.ne.s32.totalorder %s336_s21, %s1930_s1  ;;  %s1935_s20 = sshll.u32 %s2036_s10, 4  ;;  %s1936_s20 = int_to_ptr.vmem [resolvable:$false] %s1935_s20 }
  0x97   : > { %s1937_s8 = scalar_lea.vmem %s1936_s20, 128  ;;  %p1938_p10 = scmp.lt.s32.totalorder %s336_s21, %s1936_s20 }
  0x98   : > { %p1933_p8 = pnand %p1931_p4, %p2194_p13  ;;  %p1939_p1 = scmp.lt.s32.totalorder %s1937_s8, %s1930_s1 }
  0x9a   : > { %p1934_p11 = pneg %p1933_p8  ;;  %p1940_p6 = por %p1939_p1, %p1938_p10 }
  0x9c   : > { %p1941_p12 = pnand %p1940_p6, %p1934_p11 }
  0x9e   : > { %1944 = shalt.err (!%p1941_p12)
}
  0x9f   : > { %1669 = dma.hbm_to_vmem [thread:$0]  (!%p2174_p9), %s2257_s24, 64, %s336_s21, %s325_s14  }
  0xa0   : > { %p2511_p7 = scmp.ne.s32.totalorder %s2498_s9, 0 }
  0xa1   : > { %s2298_s4 = sand.u32 (!%p2511_p7), 1, %s2017_s25   ;;  %p2512_p13 = scmp.ne.s32.totalorder (!%p2511_p7), %s2495_s30, 0 }
  0xa2   : > { %344 = sbr.rel (%p2511_p7) target bundleno = 1590 (0x636), region = 48  ;;  %s2301_s29 = sshll.u32 (!%p2511_p7), %s2298_s4, 2 }
  0xa3   : > { %s347_s15 = scalar_lea.sflag (!%p2511_p7), [#allocation4], %s2298_s4  ;;  %s350_s18 = scalar_lea.vmem (!%p2511_p7), [#allocation3], %s2301_s29 }
  0xa7   : > { %1988 = dma.done.wait (%p2512_p13), %s347_s15, 64  }
  0xa8   : > { %1990 = vsyncadd (%p2512_p13), %s347_s15, 4294967232  ;;  %s355_s9 = sand.u32 1, %s2105_s28   ;;  %s359_s24 = scalar_lea.vmem [#allocation6], %s2301_s29 }
  0xa9   : > { %s356_s11 = scalar_lea.sflag [#allocation7], %s355_s9 }
  0xaa   : > { %1992 = dma.done.wait (%p2512_p13), %s356_s11, 128  }
  0xab   : > { %1994 = vsyncadd (%p2512_p13), %s356_s11, 4294967168  ;;  %s368_s12 = scalar_lea.vmem [#allocation8], %s2301_s29  ;;  %s374_s21 = scalar_lea.sflag [#allocation10], %s355_s9 }
  0xac   : > { %s377_s7 = scalar_lea.vmem [#allocation9], %s2301_s29 }
  0xad   : > { %1996 = dma.done.wait (%p2512_p13), %s374_s21, 64  }
  0xae   : > { %1998 = vsyncadd (%p2512_p13), %s374_s21, 4294967232  ;;  %p2513_p9 = scmp.eq.s32.totalorder %s2105_s28, 0 }
  0xb0   : > { %2000 = dma.done.wait (%p2513_p9), [#allocation10], 3072   ;;  %p2514_p0 = pmov %p2513_p9 }
  0xb2   : > { %2002 = vsyncadd (%p2514_p0), [#allocation10], 4294964224  ;;  %p2515_p3 = pmov %p2514_p0 }
  0xb3   : > { %p2516_p5 = pmov %p2514_p0 }
  0xb4   : > { %2004 = dma.done.wait (%p2515_p3), [#allocation13], 1024  }
  0xb5   : > { %2006 = vsyncadd (%p2516_p5), [#allocation13], 4294966272  ;;  %v2037_v0 = vmov 0   ;;  %v1724_v1 = vld [vmem:[#allocation11 + $0xac] ss:$12 sps:$4 sm:$0xff]   ;;  %vm438_vm0 = vcmask 1043456  }
  0xb6   : > { %635 = vmatprep.mubr.bf16.mxu0 %v2037_v0  ;;  %v1726_v2 = vld [vmem:[#allocation11 + $0xa8] ss:$12 sps:$4 sm:$0xff]   ;;  %603 = vmatprep.subr.bf16.mxu0 %v1724_v1  ;;  %v1729_v4 = vld [vmem:[#allocation11 + $0x90] ss:$12 sps:$4 sm:$0xff]   ;;  %v1736_v7 = vld [vmem:[#allocation11 + $0x98] ss:$12 sps:$4 sm:$0xff]  }
  0xb7   : > { %v1727_v3 = vld [vmem:[#allocation11 + $0x94] ss:$12 sps:$4 sm:$0xff]   ;;  %604 = vmatpush1.bf16.msra.mxu0 %v1726_v2  ;;  %v1730_v5 = vld [vmem:[#allocation11 + $0x7c] ss:$12 sps:$4 sm:$0xff]   ;;  %v1733_v8 = vld [vmem:[#allocation11 + $0x78] ss:$12 sps:$4 sm:$0xff]  }
  0xb8   : > { %605 = vmatprep.subr.bf16.mxu0 %v1727_v3  ;;  %v1732_v6 = vld [vmem:[#allocation11 + $0xb0] ss:$12 sps:$4 sm:$0xff]   ;;  %v1740_v10 = vld [vmem:[#allocation11 + $0x80] ss:$12 sps:$4 sm:$0xff]   ;;  %v1744_v13 = vld [vmem:[#allocation11 + $0x68] ss:$12 sps:$4 sm:$0xff]  }
  0xb9   : > { %1544 = vmatprep.subr.bf16.mxu1 %v1732_v6  ;;  %v1734_v9 = vld [vmem:[#allocation11 + $0x64] ss:$12 sps:$4 sm:$0xff]   ;;  %v1737_v11 = vld [vmem:[#allocation11 + $0x60] ss:$12 sps:$4 sm:$0xff]   ;;  %v1741_v14 = vld [vmem:[#allocation11 + $0x48] ss:$12 sps:$4 sm:$0xff]  }
  0xba   : > { %1545 = vmatpush3.bf16.msra.mxu1 %v1732_v6  ;;  %v1738_v12 = vld [vmem:[#allocation11 + $0x4c] ss:$12 sps:$4 sm:$0xff]   ;;  %v1742_v15 = vld [vmem:[#allocation11 + $0x34] ss:$12 sps:$4 sm:$0xff]   ;;  %v1748_v16 = vld [vmem:[#allocation11 + $0x50] ss:$12 sps:$4 sm:$0xff]  }
  0xbb   : > { %606 = vmatpush1.bf16.msra.mxu0 %v1729_v4  ;;  %1546 = vmatprep.subr.bf16.mxu1 %v1736_v7  ;;  %v432_v17 = vld [vmem:[%s350_s18] sm:$0xf]  ;;  %v1754_v18 = vld [vmem:[%s359_s24] ss:$0 sps:$4 sm:$0xff]   ;;  %v1745_v19 = vld [vmem:[#allocation11 + $0x30] ss:$12 sps:$4 sm:$0xff]  }
  0xbc   : > { %607 = vmatprep.subr.bf16.mxu0 %v1730_v5  ;;  %v1746_v20 = vld [vmem:[#allocation11 + $0x1c] ss:$12 sps:$4 sm:$0xff]   ;;  %v1752_v21 = vld [vmem:[#allocation11 + $0x38] ss:$12 sps:$4 sm:$0xff]   ;;  %v441_v22 = vsel %vm438_vm0, %v432_v17, %v1754_v18  ;;  %v1755_v25 = vld [vmem:[#allocation11 + $0x20] ss:$12 sps:$4 sm:$0xff]  }
  0xbd   : > { %v1749_v23 = vld [vmem:[#allocation11 + $0x18] ss:$12 sps:$4 sm:$0xff]   ;;  %1560 = vmatprep.mubr.bf16.mxu1 %v441_v22  ;;  %v1753_v26 = vld [vmem:[#allocation11] ss:$12 sps:$4 sm:$0xff]   ;;  %v1756_v27 = vld [vmem:[#allocation11 + $0x8] ss:$12 sps:$4 sm:$0xff]  }
  0xbe   : > { %1547 = vmatpush3.bf16.msra.mxu1 %v1736_v7  ;;  %v1750_v24 = vld [vmem:[#allocation11 + $0x4] ss:$12 sps:$4 sm:$0xff]   ;;  %v2038_v29 = vmov 0.0   ;;  %vm2039_vm1 = vmmov 0   ;;  %vm701_vm2 = vcmask 261120   ;;  %s2040_s30 = smov 64  }
  0xbf   : > { %608 = vmatpush1.bf16.msra.mxu0 %v1733_v8  ;;  %1548 = vmatprep.subr.bf16.mxu1 %v1740_v10  ;;  %v434_v28 = vld [vmem:[%s368_s12] sm:$0xf]  ;;  %s2041_s14 = smov 96   ;;  %s2042_s17 = smov 32   ;;  %v699_v56 = vld [vmem:[%s377_s7] sm:$0xf] }
  0xc0   : > { %609 = vmatprep.subr.bf16.mxu0 %v1734_v9  ;;  %v700_v57 = vunpack.c.l.bf16 %v699_v56  ;;  %vm748_vm3 = vcmask 64512   ;;  %vm925_vm4 = vcmask 523520   ;;  %vm1041_vm5 = vcmask 785920   ;;  %s1462_s19 = sshll.u32 %s2298_s4, 3  ;;  %s2517_s23 = sld [smem:[#allocation27_spill]] }
  0xc1   : > { %vm1157_vm6 = vcmask 1048320   ;;  %s1506_s6 = sshll.u32 %s2105_s28, 7  ;;  %s430_s1 = scalar_lea.vmem [#allocation14], %s1462_s19 }
  0xc2   : > { %1549 = vmatpush3.bf16.msra.mxu1 %v1740_v10  ;;  %s1287_s10 = sshll.u32 %s430_s1, 4  ;;  %s2518_s29 = sld [smem:[#allocation28_spill]]  ;;  %s2427_s10 = int_to_ptr.vmem [resolvable:$true] %s1287_s10 }
  0xc3   : > { %610 = vmatpush1.bf16.msra.mxu0 %v1737_v11  ;;  %1550 = vmatprep.subr.bf16.mxu1 %v1744_v13  ;;  %s1274_s18 = scalar_lea.sflag [#allocation5], %s2298_s4  ;;  %s1945_s9 = scalar_lea.vmem %s2427_s10, 128 }
  0xc4   : > { %611 = vmatprep.subr.bf16.mxu0 %v1738_v12  ;;  %p1946_p2 = scmp.ne.s32.totalorder %s2427_s10, %s1945_s9  ;;  %p2519_p4 = scmp.ne.s32.totalorder %s2503_s22, 0 }
  0xc5   : > { %s2043_s28 = smov [#allocation14]  }
  0xc6   : > { %1551 = vmatpush3.bf16.msra.mxu1 %v1744_v13  ;;  %p1947_p8 = pnand %p1946_p2, %p2519_p4  ;;  %s1949_s11 = sshll.u32 %s2043_s28, 4  ;;  %s1950_s11 = int_to_ptr.vmem [resolvable:$false] %s1949_s11 }
  0xc7   : > { %612 = vmatpush1.bf16.msra.mxu0 %v1741_v14  ;;  %1552 = vmatprep.subr.bf16.mxu1 %v1748_v16  ;;  %s1951_s24 = scalar_lea.vmem %s1950_s11, 256  ;;  %p1952_p10 = scmp.lt.s32.totalorder %s2427_s10, %s1950_s11 }
  0xc8   : > { %613 = vmatprep.subr.bf16.mxu0 %v1742_v15  ;;  %s2425_s15 = scalar_lea.hbm %s2518_s29, %s1506_s6  ;;  %p1948_p11 = pneg %p1947_p8 }
  0xc9   : > { %p1953_p1 = scmp.lt.s32.totalorder %s1951_s24, %s1945_s9 }
  0xca   : > { %1553 = vmatpush3.bf16.msra.mxu1 %v1748_v16 }
  0xcb   : > { %614 = vmatpush1.bf16.msra.mxu0 %v1745_v19  ;;  %1554 = vmatprep.subr.bf16.mxu1 %v1752_v21  ;;  %p1954_p6 = por %p1953_p1, %p1952_p10 }
  0xcc   : > { %615 = vmatprep.subr.bf16.mxu0 %v1746_v20 }
  0xcd   : > { %p1955_p12 = pnand %p1954_p6, %p1948_p11 }
  0xce   : > { %1555 = vmatpush3.bf16.msra.mxu1 %v1752_v21 }
  0xcf   : > { %616 = vmatpush1.bf16.msra.mxu0 %v1749_v23  ;;  %1556 = vmatprep.subr.bf16.mxu1 %v1755_v25 }
  0xd0   : > { %617 = vmatprep.subr.bf16.mxu0 %v1750_v24 }
  0xd2   : > { %1557 = vmatpush3.bf16.msra.mxu1 %v1755_v25 }
  0xd3   : > { %618 = vmatpush1.bf16.msra.mxu0 %v1753_v26  ;;  %1558 = vmatprep.subr.bf16.mxu1 %v1756_v27 }
  0xd4   : > { %1564 = vmatprep.subr.bf16.mxu0 %v2038_v29 }
  0xd6   : > { %636 = vmatmul.mubr.bf16.vlgmr.msra.gmra.mxu0 %v441_v22  ;;  %1559 = vmatpush3.bf16.msra.mxu1 %v1756_v27 }
  0xd7   : > { %643 = vmatprep.mubr.bf16.mxu0 %v2037_v0  ;;  %1576 = vmatprep.subr.bf16.mxu1 %v2038_v29 }
  0xd9   : > { %1561 = vmatmul.mubr.bf16.vlgmr.msra.gmra.mxu1 %v434_v28 }
  0xda   : > { %1578 = vmatprep.mubr.msk.bf16.mxu1 %vm2039_vm1, %v2038_v29 }
  0xde   : > { %644 = vmatmul.mubr.bf16.gmra.mxu0 %v434_v28 }
  0xdf   : > { %1566 = vmatprep.mubr.msk.bf16.mxu0 %vm2039_vm1, %v2038_v29 }
 0x196   : > { %v637_v30 = vpop.f32.mrf.mxu0 }
 0x197   : > { %v2350_v44 = vpack.c.bf16 %v637_v30, %v637_v30 }
 0x198   : > { %v639_v31 = vpop.f32.mrf.mxu0 }
 0x199   : > { %v1562_v33 = vpop.f32.mrf.mxu1  ;;  %v765_v46 = vsel %vm438_vm0, %v2350_v44, 0 }
 0x19a   : > { %v640_v32 = vpop.f32.mrf.mxu0  ;;  %v698_v39 = vpack.c.bf16 %v1562_v33, %v1562_v33 }
 0x19b   : > { %v684_v35 = vpop.f32.mrf.mxu1 }
 0x19c   : > { %v641_v34 = vpop.f32.mrf.mxu0 }
 0x19d   : > { %v697_v36 = vpack.c.bf16 %v641_v34, %v641_v34  ;;  %v1563_v37 = vpop.f32.mrf.mxu1 }
 0x19e   : > { %v645_v38 = vpop.f32.mrf.mxu0 }
 0x19f   : > { %929 = vrot.lane.b32.xlu1 %v697_v36, %s2040_s30  ;;  %812 = vrot.lane.b32.xlu0 %v697_v36, %s2041_s14  ;;  %v706_v40 = vsel %vm701_vm2, %v697_v36, 0  ;;  %v686_v41 = vpop.f32.mrf.mxu1 }
 0x1a0   : > { %1565 = vmatpush3.bf16.xpose.msra.mxu0 %v706_v40  ;;  %v646_v42 = vpop.f32.mrf.mxu0 }
 0x1a1   : > { %1570 = vmatprep.subr.bf16.mxu0 %v2038_v29 }
 0x1a2   : > { %v647_v43 = vpop.f32.mrf.mxu0 }
 0x1a3   : > { %927 = vrot.lane.b32.xlu1 %v698_v39, %s2040_s30  ;;  %809 = vrot.lane.b32.xlu0 %v698_v39, %s2041_s14 }
 0x1a4   : > { %v648_v45 = vpop.f32.mrf.mxu0 }
 0x1a7   : > { %1043 = vrot.lane.b32.xlu1 %v698_v39, %s2042_s17  ;;  %1045 = vrot.lane.b32.xlu0 %v697_v36, %s2042_s17 }
 0x1a8   : > { %1567 = vmatmul.mubr.msk.bf16.vlgmr.msra.gmra.mxu0 %vm701_vm2, %v698_v39 }
 0x1a9   : > { %1571 = vmatpush3.bf16.msra.mxu0 %v765_v46  ;;  %1572 = vmatprep.mubr.msk.bf16.mxu0 %vm2039_vm1, %v2038_v29 }
 0x1aa   : > { %1582 = vmatprep.subr.bf16.mxu0 %v2038_v29 }
 0x211   : > { %v813_v47 = vpop.permute.xlu0 %812  ;;  %v930_v49 = vpop.permute.xlu1 %929 }
 0x212   : > { %v818_v48 = vsel %vm701_vm2, %v813_v47, 0  ;;  %v935_v51 = vsel %vm701_vm2, %v930_v49, 0 }
 0x213   : > { %1577 = vmatpush3.bf16.xpose.msra.mxu1 %v818_v48 }
 0x214   : > { %1588 = vmatprep.subr.bf16.mxu1 %v2038_v29 }
 0x215   : > { %v810_v50 = vpop.permute.xlu0 %809  ;;  %v928_v53 = vpop.permute.xlu1 %927 }
 0x219   : > { %v1046_v52 = vpop.permute.xlu0 %1045  ;;  %v1044_v55 = vpop.permute.xlu1 %1043 }
 0x21a   : > { %1579 = vmatmul.mubr.msk.bf16.vlgmr.msra.gmra.mxu1 %vm701_vm2, %v810_v50  ;;  %v1051_v54 = vsel %vm701_vm2, %v1046_v52, 0 }
 0x21b   : > { %1589 = vmatpush3.bf16.xpose.msra.mxu1 %v935_v51  ;;  %1590 = vmatprep.mubr.msk.bf16.mxu1 %vm2039_vm1, %v2038_v29 }
 0x21c   : > { %1600 = vmatprep.subr.bf16.mxu1 %v2038_v29 }
 0x222   : > { %1591 = vmatmul.mubr.msk.bf16.vlgmr.msra.gmra.mxu1 %vm701_vm2, %v928_v53 }
 0x223   : > { %1601 = vmatpush3.bf16.xpose.msra.mxu1 %v1051_v54  ;;  %1602 = vmatprep.mubr.msk.bf16.mxu1 %vm2039_vm1, %v2038_v29 }
 0x224   : > { %1612 = vmatprep.subr.bf16.mxu1 %v2038_v29 }
 0x22a   : > { %1603 = vmatmul.mubr.msk.bf16.vlgmr.msra.gmra.mxu1 %vm701_vm2, %v1044_v55 }
 0x22b   : > { %1628 = vmatprep.mubr.msk.bf16.mxu1 %vm2039_vm1, %v2038_v29 }
 0x268   : > { %v742_v58 = vpop.f32.mrf.mxu0 }
 0x269   : > { %v743_v59 = vadd.f32 %v742_v58, %v700_v57 }
 0x26a   : > { %v1568_v60 = vpop.f32.mrf.mxu0 }
 0x26b   : > { %v749_v61 = vsel %vm748_vm3, %v743_v59, -inf }
 0x26c   : > { %750 = vmax.xlane.f32.xlu0 %v749_v61  ;;  %v745_v62 = vpop.f32.mrf.mxu0 }
 0x26e   : > { %v1569_v63 = vpop.f32.mrf.mxu0 }
 0x2da   : > { %v854_v0 = vpop.f32.mrf.mxu1 }
 0x2db   : > { %v855_v1 = vadd.f32 %v854_v0, %v700_v57 }
 0x2dc   : > { %v1580_v2 = vpop.f32.mrf.mxu1 }
 0x2dd   : > { %v860_v3 = vsel %vm748_vm3, %v855_v1, -inf  ;;  %v1758_v2 = vld [vmem:[#allocation12 + $0x30] sm:$0xff]  }
 0x2de   : > { %861 = vmax.xlane.f32.xlu1 %v860_v3  ;;  %v857_v4 = vpop.f32.mrf.mxu1  ;;  %v1759_v3 = vld [vmem:[#allocation12 + $0x28] sm:$0xff]  }
 0x2df   : > { %v1760_v4 = vld [vmem:[#allocation12 + $0x20] sm:$0xff]  }
 0x2e0   : > { %v1581_v5 = vpop.f32.mrf.mxu1 }
 0x2e1   : > { %v1761_v5 = vld [vmem:[#allocation12 + $0x18] sm:$0xff]  }
 0x2e2   : > { %v971_v6 = vpop.f32.mrf.mxu1 }
 0x2e3   : > { %v972_v7 = vadd.f32 %v971_v6, %v700_v57  ;;  %v1762_v6 = vld [vmem:[#allocation12 + $0x10] sm:$0xff]  }
 0x2e4   : > { %v1592_v8 = vpop.f32.mrf.mxu1 }
 0x2e5   : > { %v977_v9 = vsel %vm748_vm3, %v972_v7, -inf }
 0x2e6   : > { %v974_v10 = vpop.f32.mrf.mxu1  ;;  %978 = vmax.xlane.f32.xlu0 %v977_v9 }
 0x2e7   : > { %v1763_v10 = vld [vmem:[#allocation12 + $0x8] sm:$0xff]  }
 0x2e8   : > { %v1593_v11 = vpop.f32.mrf.mxu1 }
 0x2ea   : > { %v1087_v12 = vpop.f32.mrf.mxu1 }
 0x2eb   : > { %v1088_v13 = vadd.f32 %v1087_v12, %v700_v57  ;;  %v1764_v12 = vld [vmem:[#allocation12] sm:$0xff]  }
 0x2ec   : > { %v1604_v14 = vpop.f32.mrf.mxu1 }
 0x2ed   : > { %v1093_v15 = vsel %vm748_vm3, %v1088_v13, -inf }
 0x2ee   : > { %v1090_v16 = vpop.f32.mrf.mxu1  ;;  %1094 = vmax.xlane.f32.xlu0 %v1093_v15 }
 0x2f0   : > { %v1605_v17 = vpop.f32.mrf.mxu1 }
 0x2f5   : > { %v751_v18 = vpop.xlane.xlu0 %750 }
 0x2f6   : > { %v752_v19 = vsub.f32 %v743_v59, %v751_v18 }
 0x2f8   : > { %v753_v20 = vmul.f32 1.442695, %v752_v19 }
 0x2fa   : > { %1765 = vpow2.f32 %v753_v20 }
 0x307   : > { %v1766_v21 = vpop.eup %1765 }
 0x308   : > { %v755_v22 = vsel %vm748_vm3, %v1766_v21, 0.0 }
 0x309   : > { %756 = vadd.xlane.f32.xlu1 %v755_v22 }
 0x31a   : > { %873 = vrot.lane.b32.xlu1 %v2350_v44, %s2041_s14 }
 0x367   : > { %v862_v23 = vpop.xlane.xlu1 %861 }
 0x368   : > { %v863_v24 = vsub.f32 %v855_v1, %v862_v23  ;;  %v1757_v1 = vld [vmem:[#allocation12 + $0x38] sm:$0xff]  }
 0x369   : > { %1613 = vmatpush3.bf16.msra.mxu1 %v1757_v1 }
 0x36a   : > { %v864_v25 = vmul.f32 1.442695, %v863_v24  ;;  %1614 = vmatprep.subr.bf16.mxu1 %v2038_v29 }
 0x36c   : > { %1767 = vpow2.f32 %v864_v25  ;;  %v1496_v25 = vld [vmem:[%s2517_s23] ss:$0 sm:$0xff] }
 0x36d   : > { %1615 = vmatpush3.bf16.msra.mxu1 %v1758_v2 }
 0x36e   : > { %1616 = vmatprep.subr.bf16.mxu1 %v2038_v29 }
 0x36f   : > { %v979_v26 = vpop.xlane.xlu0 %978 }
 0x370   : > { %v980_v27 = vsub.f32 %v972_v7, %v979_v26 }
 0x371   : > { %1617 = vmatpush3.bf16.msra.mxu1 %v1759_v3 }
 0x372   : > { %v981_v28 = vmul.f32 1.442695, %v980_v27  ;;  %1618 = vmatprep.subr.bf16.mxu1 %v2038_v29 }
 0x374   : > { %1769 = vpow2.f32 %v981_v28 }
 0x375   : > { %1619 = vmatpush3.bf16.msra.mxu1 %v1760_v4 }
 0x376   : > { %1620 = vmatprep.subr.bf16.mxu1 %v2038_v29 }
 0x377   : > { %v1095_v30 = vpop.xlane.xlu0 %1094 }
 0x378   : > { %v1096_v31 = vsub.f32 %v1088_v13, %v1095_v30 }
 0x379   : > { %v1768_v32 = vpop.eup %1767  ;;  %1621 = vmatpush3.bf16.msra.mxu1 %v1761_v5 }
 0x37a   : > { %v1097_v33 = vmul.f32 1.442695, %v1096_v31  ;;  %v866_v34 = vsel %vm748_vm3, %v1768_v32, 0.0  ;;  %1622 = vmatprep.subr.bf16.mxu1 %v2038_v29 }
 0x37b   : > { %867 = vadd.xlane.f32.xlu0 %v866_v34 }
 0x37c   : > { %1771 = vpow2.f32 %v1097_v33 }
 0x37d   : > { %1623 = vmatpush3.bf16.msra.mxu1 %v1762_v6 }
 0x37e   : > { %1624 = vmatprep.subr.bf16.mxu1 %v2038_v29 }
 0x381   : > { %v1770_v35 = vpop.eup %1769  ;;  %1625 = vmatpush3.bf16.msra.mxu1 %v1763_v10 }
 0x382   : > { %v983_v36 = vsel %vm748_vm3, %v1770_v35, 0.0  ;;  %1626 = vmatprep.subr.bf16.mxu1 %v2038_v29 }
 0x383   : > { %984 = vadd.xlane.f32.xlu1 %v983_v36 }
 0x385   : > { %1627 = vmatpush3.bf16.msra.mxu1 %v1764_v12 }
 0x389   : > { %v1772_v37 = vpop.eup %1771 }
 0x38a   : > { %v1099_v38 = vsel %vm748_vm3, %v1772_v37, 0.0 }
 0x38b   : > { %1100 = vadd.xlane.f32.xlu0 %v1099_v38 }
 0x392   : > { %v757_v39 = vpop.xlane.xlu1 %756 }
 0x393   : > { %1773 = vrcp.f32 %v757_v39 }
 0x394   : > { %1105 = vrot.lane.b32.xlu1 %v2350_v44, %s2042_s17 }
 0x396   : > { %v874_v42 = vpop.permute.xlu1 %873 }
 0x397   : > { %v879_v45 = vsel %vm438_vm0, %v874_v42, 0 }
 0x3a0   : > { %v1774_v40 = vpop.eup %1773 }
 0x3a1   : > { %989 = vrot.lane.b32.xlu0 %v2350_v44, %s2040_s30  ;;  %v759_v41 = vmul.f32 %v1774_v40, %v1766_v21 }
 0x3a3   : > { %v760_v43 = vpack.c.bf16 %v759_v41, %v759_v41 }
 0x3a5   : > { %1573 = vmatmul.mubr.msk.bf16.vlgmr.msra.gmra.mxu0 %vm748_vm3, %v760_v43 }
 0x3a6   : > { %1583 = vmatpush3.bf16.msra.mxu0 %v879_v45  ;;  %1584 = vmatprep.mubr.msk.bf16.mxu0 %vm2039_vm1, %v2038_v29 }
 0x3a7   : > { %1594 = vmatprep.subr.bf16.mxu0 %v2038_v29 }
 0x404   : > { %v868_v46 = vpop.xlane.xlu0 %867 }
 0x405   : > { %1775 = vrcp.f32 %v868_v46 }
 0x40c   : > { %v985_v47 = vpop.xlane.xlu1 %984 }
 0x40d   : > { %1777 = vrcp.f32 %v985_v47 }
 0x410   : > { %v1106_v55 = vpop.permute.xlu1 %1105 }
 0x411   : > { %v1111_v57 = vsel %vm438_vm0, %v1106_v55, 0 }
 0x412   : > { %v1776_v48 = vpop.eup %1775 }
 0x413   : > { %v870_v49 = vmul.f32 %v1776_v48, %v1768_v32 }
 0x414   : > { %v1101_v44 = vpop.xlane.xlu0 %1100 }
 0x415   : > { %1779 = vrcp.f32 %v1101_v44  ;;  %v871_v50 = vpack.c.bf16 %v870_v49, %v870_v49 }
 0x417   : > { %1585 = vmatmul.mubr.msk.bf16.vlgmr.msra.gmra.mxu0 %vm748_vm3, %v871_v50 }
 0x418   : > { %v990_v51 = vpop.permute.xlu0 %989  ;;  %1596 = vmatprep.mubr.msk.bf16.mxu0 %vm2039_vm1, %v2038_v29 }
 0x419   : > { %v995_v52 = vsel %vm438_vm0, %v990_v51, 0 }
 0x41a   : > { %v1778_v53 = vpop.eup %1777  ;;  %1595 = vmatpush3.bf16.msra.mxu0 %v995_v52 }
 0x41b   : > { %1606 = vmatprep.subr.bf16.mxu0 %v2038_v29  ;;  %v987_v54 = vmul.f32 %v1778_v53, %v1770_v35 }
 0x41d   : > { %v988_v56 = vpack.c.bf16 %v987_v54, %v987_v54 }
 0x41f   : > { %1597 = vmatmul.mubr.msk.bf16.vlgmr.msra.gmra.mxu0 %vm748_vm3, %v988_v56 }
 0x420   : > { %1607 = vmatpush3.bf16.msra.mxu0 %v1111_v57  ;;  %1608 = vmatprep.mubr.msk.bf16.mxu0 %vm2039_vm1, %v2038_v29 }
 0x422   : > { %v1780_v58 = vpop.eup %1779 }
 0x423   : > { %v1103_v59 = vmul.f32 %v1780_v58, %v1772_v37 }
 0x425   : > { %v1104_v60 = vpack.c.bf16 %v1103_v59, %v1103_v59 }
 0x427   : > { %1609 = vmatmul.mubr.msk.bf16.vlgmr.msra.gmra.mxu0 %vm748_vm3, %v1104_v60 }
 0x465   : > { %v801_v61 = vpop.f32.mrf.mxu0 }
 0x466   : > { %807 = vst.msk [vmem:[#allocation2] sm:$0xff] %vm701_vm2, %v801_v61 }
 0x467   : > { %v1574_v62 = vpop.f32.mrf.mxu0 }
 0x469   : > { %v804_v63 = vpop.f32.mrf.mxu0 }
 0x46b   : > { %v1575_v0 = vpop.f32.mrf.mxu0 }
 0x4d7   : > { %v915_v7 = vpop.f32.mrf.mxu0 }
 0x4d8   : > { %922 = vrot.lane.b32.xlu1 %v915_v7, %s2042_s17 }
 0x4d9   : > { %v1586_v8 = vpop.f32.mrf.mxu0 }
 0x4db   : > { %v918_v9 = vpop.f32.mrf.mxu0 }
 0x4dd   : > { %v1587_v11 = vpop.f32.mrf.mxu0 }
 0x4df   : > { %v1031_v13 = vpop.f32.mrf.mxu0 }
 0x4e0   : > { %1038 = vrot.lane.b32.xlu0 %v1031_v13, %s2040_s30 }
 0x4e1   : > { %v1598_v14 = vpop.f32.mrf.mxu0 }
 0x4e3   : > { %v1034_v15 = vpop.f32.mrf.mxu0 }
 0x4e5   : > { %v1599_v16 = vpop.f32.mrf.mxu0 }
 0x4e7   : > { %v1147_v17 = vpop.f32.mrf.mxu0 }
 0x4e8   : > { %1154 = vrot.lane.b32.xlu1 %v1147_v17, %s2041_s14 }
 0x4e9   : > { %v1610_v18 = vpop.f32.mrf.mxu0 }
 0x4eb   : > { %v1150_v19 = vpop.f32.mrf.mxu0 }
 0x4ed   : > { %v1611_v20 = vpop.f32.mrf.mxu0 }
 0x54a   : > { %v923_v21 = vpop.permute.xlu1 %922 }
 0x54b   : > { %926 = vst.msk [vmem:[#allocation2] sm:$0xff] %vm925_vm4, %v923_v21 }
 0x552   : > { %v1039_v29 = vpop.permute.xlu0 %1038 }
 0x553   : > { %1042 = vst.msk [vmem:[#allocation2] sm:$0xff] %vm1041_vm5, %v1039_v29 }
 0x55a   : > { %v1155_v22 = vpop.permute.xlu1 %1154 }
 0x55b   : > { %1158 = vst.msk [vmem:[#allocation2] sm:$0xff] %vm1157_vm6, %v1155_v22 }
 0x562   : > { %v1159_v23 = vld [vmem:[#allocation2] sm:$0xff] }
 0x563   : > { %v1160_v24 = vpack.c.bf16 %v1159_v23, %v1159_v23 }
 0x565   : > { %1629 = vmatmul.mubr.bf16.vlgmr.msra.gmra.mxu1 %v1160_v24 }
 0x625   : > { %v1266_v26 = vpop.f32.mrf.mxu1 }
 0x626   : > { %v1267_v27 = vadd.f32 %v1496_v25, %v1266_v26 }
 0x627   : > { %v1630_v28 = vpop.f32.mrf.mxu1 }
 0x628   : > { %1272 = vst [vmem:[%s430_s1] sm:$0xff] %v1267_v27 }
 0x629   : > { %v1269_v30 = vpop.f32.mrf.mxu1 }
 0x62a   : > { %1958 = shalt.err (!%p1955_p12)
}
 0x62b   : > { %s1959_s12 = scalar_lea.hbm %s2425_s15, 128  ;;  %s1963_s7 = scalar_lea.hbm %s2518_s29, 256 }
 0x62c   : > { %p1960_p7 = scmp.ne.s32.totalorder %s2425_s15, %s1959_s12  ;;  %p1964_p0 = scmp.lt.s32.totalorder %s2425_s15, %s2518_s29 }
 0x62d   : > { %p1965_p3 = scmp.lt.s32.totalorder %s1963_s7, %s1959_s12 }
 0x62e   : > { %p1961_p13 = pnand %p1960_p7, %p2519_p4 }
 0x62f   : > { %p1966_p5 = por %p1965_p3, %p1964_p0 }
 0x630   : > { %p1962_p9 = pneg %p1961_p13 }
 0x632   : > { %p1967_p2 = pnand %p1966_p5, %p1962_p9 }
 0x634   : > { %1970 = shalt.err (!%p1967_p2)
}
 0x635   : > { %1648 = dma.vmem_to_hbm [thread:$0]  (%p2519_p4), %s2427_s10, 128, %s2425_s15, %s1274_s18   ;;  %v1631_v31 = vpop.f32.mrf.mxu1 }
 0x636 PF: > { %s2520_s17 = sld [smem:[#allocation21_spill]]  ;;  %p2523_p11 = scmp.ge.s32.totalorder %s2025_s27, 2 }
 0x637   : > { %s2521_s19 = sld [smem:[#allocation22_spill]] }
 0x63c   : > { %s1299_s16 = sand.u32 1, %s2520_s17  }
 0x63d   : > { %p2522_p8 = scmp.ne.s32.totalorder %s2521_s19, 0  ;;  %s1300_s13 = scalar_lea.sflag [#allocation5], %s1299_s16 }
 0x63f   : > { %p1671_p10 = pnand %p2523_p11, %p2522_p8 }
 0x641   : > { %p1672_p1 = pneg %p1671_p10 }
 0x643   : > { %2008 = dma.done.wait (%p1672_p1), %s1300_s13, 128  }
 0x644   : > { %2010 = vsyncadd (%p1672_p1), %s1300_s13, 4294967168  ;;  %s2524_s27 = sld [smem:[#allocation23_spill]]  ;;  %s2526_s24 = smov %s2017_s25 }
 0x645   : > { %s2525_s22 = sld [smem:[#allocation24_spill]]  ;;  %s2527_s25 = smov %s2021_s26 }
 0x64a   : > { %p27_p6 = scmp.ge.s32.totalorder %s2524_s27, 4  }
 0x64b   : > { %s2528_s26 = smov %s2525_s22 }
 0x64c   :  { %29 = sbr.rel (!%p27_p6) target bundleno = 15 (0xf), region = 138 }
 0x651   :  { %1305 = vsyncpa [#allocation4], 1 }
 0x652   :  { %1307 = vsyncpa [#allocation4 + $0x1], 1 }
 0x653   :  { %1308 = vsyncpa [#allocation7], 1 }
 0x654   :  { %1310 = vsyncpa [#allocation7 + $0x1], 1 }
 0x655   :  { %1311 = vsyncpa [#allocation10], 1 }
 0x656   :  { %1313 = vsyncpa [#allocation10 + $0x1], 1 }
 0x657   :  { %1314 = vsyncpa [#allocation13], 1 }
 0x658   :  { %1315 = vsyncpa [#allocation5], 1 }
 0x659   :  { %1317 = vsyncpa [#allocation5 + $0x1], 1 }

</bundles_post_ra>
